<compile_context>
chip_gen: v6e
topology: v6e:2x2x1
jax: 0.10.0
libtpu: 0.0.40
codegen_flags: <defaults>
</compile_context>

<pallas_src>
import math

import jax
import jax.numpy as jnp
from jax import lax
from jax.experimental import pallas as pl
from jax.experimental.pallas import tpu as pltpu

_INV_SQRT2 = 1.0 / math.sqrt(2.0)


def _round_up(a: int, b: int) -> int:
    return (a + b - 1) // b * b


def _linear_bias_gelu_kernel(x_ref, w_ref, b_ref, o_ref, acc_ref):
    """One (tm, tn) output tile, accumulated over the K grid axis.

    x_ref  : (tm, tk)  activations (compute dtype, e.g. bf16)
    w_ref  : (tn, tk)  weight tile in PyTorch (out, in) layout -> contract last dims
    b_ref  : (1, tn)   bias (fp32)
    o_ref  : (tm, tn)  output tile (input dtype)
    acc_ref: (tm, tn)  fp32 accumulator, resident across the K axis
    """
    k = pl.program_id(2)

    @pl.when(k == 0)
    def _init():
        acc_ref[...] = jnp.zeros_like(acc_ref)

    # (tm, tk) x (tn, tk) contracting the last dims -> (tm, tn) on the MXU, fp32 acc.
    acc_ref[...] += lax.dot_general(
        x_ref[...], w_ref[...],
        dimension_numbers=(((1,), (1,)), ((), ())),
        preferred_element_type=jnp.float32)

    @pl.when(k == pl.num_programs(2) - 1)
    def _epilogue():
        y = acc_ref[...] + b_ref[...].astype(jnp.float32)        # (tm,tn) + (1,tn)
        # Exact erf-based gelu (matches torch.nn.functional.gelu default).
        g = y * 0.5 * (1.0 + lax.erf(y * jnp.float32(_INV_SQRT2)))
        o_ref[...] = g.astype(o_ref.dtype)


def linear_activation(x, weight, bias, *,
                      compute_dtype=jnp.bfloat16,
                      tm=256, tn=512, tk=512,
                      vmem_limit_bytes=48 * 1024 * 1024):
    """Fused linear + bias + exact gelu.

    x:      (..., in_features)
    weight: (out_features, in_features)   -- PyTorch layout; NOT transposed here
    bias:   (out_features,)
    compute_dtype: dtype fed to the MXU (fp32 accumulation regardless). Pass
        jnp.float32 (or None -> x.dtype) for bit-faithful fp32 semantics.
    """
    out_features, in_features = weight.shape
    lead_shape = x.shape[:-1]
    m = 1
    for d in lead_shape:
        m *= d
    out_dtype = x.dtype
    if compute_dtype is None:
        compute_dtype = x.dtype

    # Tile sizes: clamp to the (aligned) problem so small problems stay one tile;
    # defaults (256/512/512, bf16) fit comfortably in v7x's 64 MiB VMEM with
    # double-buffering and are 256-aligned for the 2x256 MXU (v6e/v7x).
    tm = min(tm, _round_up(m, 8))
    tn = min(tn, _round_up(out_features, 128))
    tk = min(tk, _round_up(in_features, 128))

    m_pad = _round_up(m, tm)
    n_pad = _round_up(out_features, tn)
    k_pad = _round_up(in_features, tk)

    x2d = x.reshape(m, in_features)
    if (m_pad, k_pad) != (m, in_features):
        x2d = jnp.pad(x2d, ((0, m_pad - m), (0, k_pad - in_features)))
    w2d = weight                                     # (N, K), no transpose
    if (n_pad, k_pad) != (out_features, in_features):
        w2d = jnp.pad(w2d, ((0, n_pad - out_features), (0, k_pad - in_features)))
    b2d = bias.reshape(1, out_features).astype(jnp.float32)
    if n_pad != out_features:
        b2d = jnp.pad(b2d, ((0, 0), (0, n_pad - out_features)))

    x2d = x2d.astype(compute_dtype)
    w2d = w2d.astype(compute_dtype)

    grid = (m_pad // tm, n_pad // tn, k_pad // tk)

    csize = jnp.dtype(compute_dtype).itemsize
    cost = pl.CostEstimate(
        flops=2 * m_pad * n_pad * k_pad,
        transcendentals=m_pad * n_pad,
        bytes_accessed=(m_pad * k_pad * csize                      # x
                        + n_pad * k_pad * csize                    # W
                        + n_pad * 4                                # bias
                        + m_pad * n_pad * jnp.dtype(out_dtype).itemsize))

    out2d = pl.pallas_call(
        _linear_bias_gelu_kernel,
        out_shape=jax.ShapeDtypeStruct((m_pad, n_pad), out_dtype),
        grid_spec=pltpu.PrefetchScalarGridSpec(
            num_scalar_prefetch=0,
            grid=grid,
            in_specs=[
                pl.BlockSpec((tm, tk), lambda i, j, k: (i, k)),   # x tile
                pl.BlockSpec((tn, tk), lambda i, j, k: (j, k)),   # W tile (N,K layout)
                pl.BlockSpec((1, tn), lambda i, j, k: (0, j)),    # bias tile
            ],
            out_specs=pl.BlockSpec((tm, tn), lambda i, j, k: (i, j)),
            scratch_shapes=[pltpu.VMEM((tm, tn), jnp.float32)],
        ),
        compiler_params=pltpu.CompilerParams(
            dimension_semantics=("parallel", "parallel", "arbitrary"),
            vmem_limit_bytes=vmem_limit_bytes),
        cost_estimate=cost,
    )(x2d, w2d, b2d)

    out2d = out2d[:m, :out_features]
    return out2d.reshape(*lead_shape, out_features)


def init_params(key, in_features, out_features, dtype=jnp.float32):
    """Deterministic init mirroring nn.Linear / LinearActivation.reset_parameters."""
    kw, kb = jax.random.split(key)
    bound = 1.0 / math.sqrt(in_features)
    weight = jax.random.uniform(kw, (out_features, in_features),
                                dtype=dtype, minval=-bound, maxval=bound)
    bias = jax.random.uniform(kb, (out_features,),
                              dtype=dtype, minval=-bound, maxval=bound)
    return weight, bias


def _reference(x, weight, bias):
    y = x @ weight.T + bias
    return y * 0.5 * (1.0 + lax.erf(y * (1.0 / jnp.sqrt(2.0))))


if __name__ == "__main__":
    key = jax.random.PRNGKey(0)
    k_x, k_p, k_x2, k_p2 = jax.random.split(key, 4)

    # --- small shape, exact fp32 MXU path: tight check against PyTorch semantics ---
    batch, seq, in_features, out_features = 2, 8, 32, 64
    x = jax.random.normal(k_x, (batch, seq, in_features), dtype=jnp.float32)
    weight, bias = init_params(k_p, in_features, out_features)

    out = jax.block_until_ready(
        linear_activation(x, weight, bias, compute_dtype=jnp.float32))
    ref = _reference(x, weight, bias)
    assert out.shape == (batch, seq, out_features)
    assert jnp.allclose(out, ref, atol=1e-5, rtol=1e-5), "fp32 small-shape mismatch"

    # --- larger, non-aligned shape: exercises M/N/K tiling, padding, K accumulation ---
    batch2, seq2, in2, out2_f = 2, 150, 700, 1000    # grid = (2, 2, 2) after padding
    x2 = jax.random.normal(k_x2, (batch2, seq2, in2), dtype=jnp.float32)
    w2, b2 = init_params(k_p2, in2, out2_f)

    out_fp32 = jax.block_until_ready(
        linear_activation(x2, w2, b2, compute_dtype=jnp.float32))
    ref2 = _reference(x2, w2, b2)
    assert out_fp32.shape == (batch2, seq2, out2_f)
    assert jnp.allclose(out_fp32, ref2, atol=1e-4, rtol=1e-4), "fp32 tiled mismatch"

    # Default fast path: bf16 MXU inputs with fp32 accumulation; compare against
    # the same math (bf16-quantized inputs, fp32 matmul) computed in plain JAX.
    out_bf16 = jax.block_until_ready(linear_activation(x2, w2, b2))
    ref2_bf16 = _reference(x2.astype(jnp.bfloat16).astype(jnp.float32),
                           w2.astype(jnp.bfloat16).astype(jnp.float32), b2)
    assert jnp.allclose(out_bf16, ref2_bf16, atol=1e-3, rtol=1e-3), "bf16 tiled mismatch"

    print("KERNEL_OK")
</pallas_src>

<mosaic_0001>
module attributes {stable_mosaic.version = 11 : i64} {
  func.func @_linear_bias_gelu_kernel(%arg0: i32, %arg1: i32, %arg2: i32, %arg3: memref<16x128xf32, #tpu.memory_space<vmem>>, %arg4: memref<128x128xf32, #tpu.memory_space<vmem>>, %arg5: memref<1x128xf32, #tpu.memory_space<vmem>>, %arg6: memref<16x128xf32, #tpu.memory_space<vmem>>, %arg7: memref<16x128xf32, #tpu.memory_space<vmem>>) attributes {dimension_semantics = [#tpu.dimension_semantics<parallel>, #tpu.dimension_semantics<parallel>, #tpu.dimension_semantics<arbitrary>], iteration_bounds = array<i64: 1, 1, 1>, scalar_prefetch = 0 : i64, scratch_operands = 1 : i64, tpu.core_type = #tpu.core_type<tc>, window_params = [{transform_indices = @transform_0, window_bounds = array<i64: 16, 128>}, {transform_indices = @transform_1, window_bounds = array<i64: 128, 128>}, {transform_indices = @transform_2, window_bounds = array<i64: 1, 128>}, {transform_indices = @transform_3, window_bounds = array<i64: 16, 128>}]} {
    %c0_i32 = arith.constant 0 : i32
    %0 = arith.cmpi eq, %arg2, %c0_i32 : i32
    %1 = arith.extui %0 : i1 to i32
    %c0_i32_0 = arith.constant 0 : i32
    %2 = arith.cmpi ne, %1, %c0_i32_0 : i32
    scf.if %2 {
      %cst_10 = arith.constant 0.000000e+00 : f32
      %12 = vector.broadcast %cst_10 : f32 to vector<16x128xf32>
      %c0_11 = arith.constant 0 : index
      %c0_12 = arith.constant 0 : index
      %13 = vector.load %arg7[%c0_11, %c0_12] : memref<16x128xf32, #tpu.memory_space<vmem>>, vector<16x128xf32>
      tpu.vector_store %arg7[%c0_11, %c0_12], %12 {strides = array<i32>} : memref<16x128xf32, #tpu.memory_space<vmem>>, vector<16x128xf32>,
    } else {
    }
    %c0 = arith.constant 0 : index
    %c0_1 = arith.constant 0 : index
    %3 = vector.load %arg7[%c0, %c0_1] : memref<16x128xf32, #tpu.memory_space<vmem>>, vector<16x128xf32>
    %c0_2 = arith.constant 0 : index
    %c0_3 = arith.constant 0 : index
    %4 = vector.load %arg3[%c0_2, %c0_3] : memref<16x128xf32, #tpu.memory_space<vmem>>, vector<16x128xf32>
    %c0_4 = arith.constant 0 : index
    %c0_5 = arith.constant 0 : index
    %5 = vector.load %arg4[%c0_4, %c0_5] : memref<128x128xf32, #tpu.memory_space<vmem>>, vector<128x128xf32>
    %cst = arith.constant dense<0.000000e+00> : vector<16x128xf32>
    %6 = tpu.matmul %4, %5, %cst {dimension_numbers = #tpu.dot_dimension_numbers<[1], [1], [0], [0], [0, 0, 1, 0], [], []>} : vector<16x128xf32>, vector<128x128xf32>, vector<16x128xf32> -> vector<16x128xf32>
    %7 = arith.addf %3, %6 : vector<16x128xf32>
    %c0_6 = arith.constant 0 : index
    %c0_7 = arith.constant 0 : index
    %8 = vector.load %arg7[%c0_6, %c0_7] : memref<16x128xf32, #tpu.memory_space<vmem>>, vector<16x128xf32>
    tpu.vector_store %arg7[%c0_6, %c0_7], %7 {strides = array<i32>} : memref<16x128xf32, #tpu.memory_space<vmem>>, vector<16x128xf32>,
    %c0_i32_8 = arith.constant 0 : i32
    %9 = arith.cmpi eq, %arg2, %c0_i32_8 : i32
    %10 = arith.extui %9 : i1 to i32
    %c0_i32_9 = arith.constant 0 : i32
    %11 = arith.cmpi ne, %10, %c0_i32_9 : i32
    scf.if %11 {
      %c0_10 = arith.constant 0 : index
      %c0_11 = arith.constant 0 : index
      %12 = vector.load %arg7[%c0_10, %c0_11] : memref<16x128xf32, #tpu.memory_space<vmem>>, vector<16x128xf32>
      %c0_12 = arith.constant 0 : index
      %c0_13 = arith.constant 0 : index
      %13 = vector.load %arg5[%c0_12, %c0_13] : memref<1x128xf32, #tpu.memory_space<vmem>>, vector<1x128xf32>
      %14 = vector.broadcast %13 : vector<1x128xf32> to vector<16x128xf32>
      %15 = arith.addf %12, %14 : vector<16x128xf32>
      %cst_14 = arith.constant 5.000000e-01 : f32
      %16 = vector.broadcast %cst_14 : f32 to vector<16x128xf32>
      %17 = arith.mulf %15, %16 : vector<16x128xf32>
      %cst_15 = arith.constant 0.707106769 : f32
      %18 = vector.broadcast %cst_15 : f32 to vector<16x128xf32>
      %19 = arith.mulf %15, %18 : vector<16x128xf32>
      %20 = math.erf %19 : vector<16x128xf32>
      %cst_16 = arith.constant 1.000000e+00 : f32
      %21 = vector.broadcast %cst_16 : f32 to vector<16x128xf32>
      %22 = arith.addf %21, %20 : vector<16x128xf32>
      %23 = arith.mulf %17, %22 : vector<16x128xf32>
      %c0_17 = arith.constant 0 : index
      %c0_18 = arith.constant 0 : index
      %24 = vector.load %arg6[%c0_17, %c0_18] : memref<16x128xf32, #tpu.memory_space<vmem>>, vector<16x128xf32>
      tpu.vector_store %arg6[%c0_17, %c0_18], %23 {strides = array<i32>} : memref<16x128xf32, #tpu.memory_space<vmem>>, vector<16x128xf32>,
    } else {
    }
    return
  }
  func.func @transform_0(%arg0: i32, %arg1: i32, %arg2: i32) -> (i32, i32) {
    %c0_i32 = arith.constant 0 : i32
    return %arg0, %arg2 : i32, i32
  }
  func.func @transform_1(%arg0: i32, %arg1: i32, %arg2: i32) -> (i32, i32) {
    %c0_i32 = arith.constant 0 : i32
    return %arg1, %arg2 : i32, i32
  }
  func.func @transform_2(%arg0: i32, %arg1: i32, %arg2: i32) -> (i32, i32) {
    %c0_i32 = arith.constant 0 : i32
    %c0_i32_0 = arith.constant 0 : i32
    return %c0_i32, %arg1 : i32, i32
  }
  func.func @transform_3(%arg0: i32, %arg1: i32, %arg2: i32) -> (i32, i32) {
    %c0_i32 = arith.constant 0 : i32
    return %arg0, %arg1 : i32, i32
  }
}

</mosaic_0001>

<bundles_post_ra>
// kernel: tpu_custom_call.1
= control target key start
LH: loop header
LB: loop body
LE: loop exit
PB: predicated region body
PF: predicated region fallthrough
CT: control target
= control target key end

     0   :  { %8 = vsyncpa [#allocation4], 0  ;;  %s367_s0 = inlined_call_operand.hbm [shape: f32[16,128], index: 0, kind: input, shape index: {}]   ;;  %s368_s1 = inlined_call_operand.hbm [shape: f32[128,128], index: 1, kind: input, shape index: {}]   ;;  %s369_s2 = inlined_call_operand.vmem [shape: f32[1,128], index: 2, kind: input, shape index: {}]   ;;  %s370_s3 = inlined_call_operand.hbm [shape: f32[16,128], index: 3, kind: output, shape index: {}]  }
   0x1   :  { %9 = vsyncpa [#allocation7], 0 }
   0x2   :  { %10 = vsyncpa [#allocation5], 0  ;;  %s321_s12 = smov [#allocation3]  }
   0x3   :  { %s16_s13 = sshll.u32 %s321_s12, 4  ;;  %s17_s13 = int_to_ptr.vmem [resolvable:$true] %s16_s13 }
   0x4   :  { %s263_s14 = scalar_lea.vmem %s17_s13, 256  ;;  %p268_p1 = scmp.lt.s32.totalorder %s17_s13, %s17_s13 }
   0x5   :  { %p264_p0 = scmp.ne.s32.totalorder %s17_s13, %s263_s14  ;;  %p269_p2 = scmp.lt.s32.totalorder %s263_s14, %s263_s14 }
   0x7   :  { %p270_p3 = por %p269_p2, %p268_p1 }
   0x9   :  { %p271_p4 = pnand %p270_p3, %p264_p0 }
   0xb   :  { %274 = shalt.err (!%p271_p4)
}
   0xc   :  { %s322_s15 = smov 128   ;;  %s323_s16 = smov 8  }
   0xd   :  { %22 = dma.hbm_to_vmem [thread:$0]  %s367_s0, 256, %s17_s13, [#allocation4], %s322_s15, %s322_s15, %s323_s16  }
   0xe   :  { %s324_s19 = smov [#allocation6]  }
   0xf   :  { %s28_s20 = sshll.u32 %s324_s19, 4  ;;  %s29_s20 = int_to_ptr.vmem [resolvable:$true] %s28_s20 }
  0x10   :  { %s283_s21 = scalar_lea.vmem %s29_s20, 2048  ;;  %p288_p6 = scmp.lt.s32.totalorder %s29_s20, %s29_s20 }
  0x11   :  { %p284_p5 = scmp.ne.s32.totalorder %s29_s20, %s283_s21  ;;  %p289_p7 = scmp.lt.s32.totalorder %s283_s21, %s283_s21 }
  0x13   :  { %p290_p8 = por %p289_p7, %p288_p6 }
  0x15   :  { %p291_p9 = pnand %p290_p8, %p284_p5 }
  0x17   :  { %294 = shalt.err (!%p291_p9)
}
  0x18   :  { %34 = dma.hbm_to_vmem [thread:$0]  %s368_s1, 2048, %s29_s20, [#allocation7], %s322_s15, %s322_s15, %s323_s16  }
  0x19   :  { %315 = dma.done.wait [#allocation4], 256  }
  0x1a   :  { %316 = vsyncadd [#allocation4], 4294967040 }
  0x1b   :  { %317 = dma.done.wait [#allocation7], 2048  }
  0x1c   :  { %318 = vsyncadd [#allocation7], 4294965248  ;;  %v68_v0 = vld [vmem:[#allocation6 + $0x78] sm:$0xff]  ;;  %v67_v1 = vld [vmem:[#allocation6 + $0x70] sm:$0xff]  ;;  %s325_s24 = smov [#allocation8]  }
  0x1d   :  { %211 = vmatprep.subr.mxu0 %v68_v0  ;;  %v66_v2 = vld [vmem:[#allocation6 + $0x68] sm:$0xff]  ;;  %v51_v3 = vld [vmem:[#allocation3] sm:$0xff]  ;;  %v65_v4 = vld [vmem:[#allocation6 + $0x60] sm:$0xff]  ;;  %s179_s25 = sshll.u32 %s325_s24, 4  ;;  %s180_s25 = int_to_ptr.vmem [resolvable:$true] %s179_s25 }
  0x1e   :  { %212 = vmatpush3.xpose.msra.mxu0 %v68_v0  ;;  %243 = vmatprep.mubr.f32.mxu0 %v51_v3  ;;  %v64_v5 = vld [vmem:[#allocation6 + $0x58] sm:$0xff]  ;;  %v63_v6 = vld [vmem:[#allocation6 + $0x50] sm:$0xff]  ;;  %v62_v7 = vld [vmem:[#allocation6 + $0x48] sm:$0xff]  ;;  %p300_p11 = scmp.lt.s32.totalorder %s180_s25, %s180_s25 }
  0x1f   :  { %213 = vmatprep.subr.mxu0 %v67_v1  ;;  %v61_v8 = vld [vmem:[#allocation6 + $0x40] sm:$0xff]  ;;  %v60_v9 = vld [vmem:[#allocation6 + $0x38] sm:$0xff]  ;;  %v59_v10 = vld [vmem:[#allocation6 + $0x30] sm:$0xff] }
  0x20   :  { %v58_v11 = vld [vmem:[#allocation6 + $0x28] sm:$0xff]  ;;  %v57_v12 = vld [vmem:[#allocation6 + $0x20] sm:$0xff]  ;;  %v56_v13 = vld [vmem:[#allocation6 + $0x18] sm:$0xff] }
  0x21   :  { %v55_v14 = vld [vmem:[#allocation6 + $0x10] sm:$0xff]  ;;  %v54_v15 = vld [vmem:[#allocation6 + $0x8] sm:$0xff]  ;;  %v53_v16 = vld [vmem:[#allocation6] sm:$0xff] }
  0x22   :  { %214 = vmatpush3.xpose.msra.mxu0 %v67_v1  ;;  %v52_v17 = vld [vmem:[#allocation3 + $0x8] sm:$0xff]  ;;  %v192_v18 = vld [vmem:[%s369_s2] ss:$0 sm:$0xff]  ;;  %s295_s2 = scalar_lea.vmem %s180_s25, 256 }
  0x23   :  { %215 = vmatprep.subr.mxu0 %v66_v2  ;;  %p296_p10 = scmp.ne.s32.totalorder %s180_s25, %s295_s2  ;;  %p301_p12 = scmp.lt.s32.totalorder %s295_s2, %s295_s2 }
  0x25   :  { %p302_p13 = por %p301_p12, %p300_p11 }
  0x26   :  { %216 = vmatpush3.xpose.msra.mxu0 %v66_v2 }
  0x27   :  { %217 = vmatprep.subr.mxu0 %v65_v4  ;;  %p303_p0 = pnand %p302_p13, %p296_p10 }
  0x2a   :  { %218 = vmatpush3.xpose.msra.mxu0 %v65_v4 }
  0x2b   :  { %219 = vmatprep.subr.mxu0 %v64_v5 }
  0x2e   :  { %220 = vmatpush3.xpose.msra.mxu0 %v64_v5 }
  0x2f   :  { %221 = vmatprep.subr.mxu0 %v63_v6 }
  0x32   :  { %222 = vmatpush3.xpose.msra.mxu0 %v63_v6 }
  0x33   :  { %223 = vmatprep.subr.mxu0 %v62_v7 }
  0x36   :  { %224 = vmatpush3.xpose.msra.mxu0 %v62_v7 }
  0x37   :  { %225 = vmatprep.subr.mxu0 %v61_v8 }
  0x3a   :  { %226 = vmatpush3.xpose.msra.mxu0 %v61_v8 }
  0x3b   :  { %227 = vmatprep.subr.mxu0 %v60_v9 }
  0x3e   :  { %228 = vmatpush3.xpose.msra.mxu0 %v60_v9 }
  0x3f   :  { %229 = vmatprep.subr.mxu0 %v59_v10 }
  0x42   :  { %230 = vmatpush3.xpose.msra.mxu0 %v59_v10 }
  0x43   :  { %231 = vmatprep.subr.mxu0 %v58_v11 }
  0x46   :  { %232 = vmatpush3.xpose.msra.mxu0 %v58_v11 }
  0x47   :  { %233 = vmatprep.subr.mxu0 %v57_v12 }
  0x4a   :  { %234 = vmatpush3.xpose.msra.mxu0 %v57_v12 }
  0x4b   :  { %235 = vmatprep.subr.mxu0 %v56_v13 }
  0x4e   :  { %236 = vmatpush3.xpose.msra.mxu0 %v56_v13 }
  0x4f   :  { %237 = vmatprep.subr.mxu0 %v55_v14 }
  0x52   :  { %238 = vmatpush3.xpose.msra.mxu0 %v55_v14 }
  0x53   :  { %239 = vmatprep.subr.mxu0 %v54_v15 }
  0x56   :  { %240 = vmatpush3.xpose.msra.mxu0 %v54_v15 }
  0x57   :  { %241 = vmatprep.subr.mxu0 %v53_v16 }
  0x5a   :  { %242 = vmatpush3.xpose.msra.mxu0 %v53_v16 }
  0x5d   :  { %244 = vmatmul.mubr.f32.vlgmr.msra.gmra.mxu0 %v52_v17 }
 0x11d   :  { %v245_v19 = vpop.f32.mrf.mxu0 }
 0x11e   :  { %v161_v20 = vadd.f32 %v245_v19, %v192_v18 }
 0x11f   :  { %v135_v21 = vpop.f32.mrf.mxu0 }
 0x120   :  { %v165_v22 = vmul.f32 0.70710677, %v161_v20  ;;  %v160_v23 = vadd.f32 %v192_v18, %v135_v21  ;;  %v163_v26 = vmul.f32 0.5, %v161_v20 }
 0x122   :  { %251 = verf.f32 %v165_v22  ;;  %v164_v24 = vmul.f32 0.70710677, %v160_v23  ;;  %v162_v30 = vmul.f32 0.5, %v160_v23 }
 0x124   :  { %253 = verf.f32 %v164_v24 }
 0x12f   :  { %v252_v25 = vpop.eup %251 }
 0x130   :  { %v169_v27 = vadd.f32 1.0, %v252_v25 }
 0x131   :  { %v254_v28 = vpop.eup %253 }
 0x132   :  { %v171_v29 = vmul.f32 %v169_v27, %v163_v26  ;;  %v168_v31 = vadd.f32 1.0, %v254_v28 }
 0x134   :  { %173 = vst [vmem:[#allocation8 + $0x8] sm:$0xff] %v171_v29  ;;  %v170_v32 = vmul.f32 %v168_v31, %v162_v30 }
 0x136   :  { %172 = vst [vmem:[#allocation8] sm:$0xff] %v170_v32 }
 0x137   :  { %306 = shalt.err (!%p303_p0)
}
 0x138   :  { %185 = dma.vmem_to_hbm [thread:$0]  %s180_s25, 256, %s370_s3, [#allocation5], %s322_s15, %s322_s15, %s323_s16  }
 0x139   :  { %319 = dma.done.wait [#allocation5], 256  }
 0x13a   :  { %320 = vsyncadd [#allocation5], 4294967040 }
 0x13b   :  { %189 = vsyncpa [#allocation4], 1 }
 0x13c   :  { %190 = vsyncpa [#allocation7], 1 }
 0x13d   :  { %191 = vsyncpa [#allocation5], 1 }

</bundles_post_ra>
